<compile_context>
chip_gen: v5e
topology: v5e:2x2
jax: 0.10.0
libtpu: 0.0.40
codegen_flags: <defaults>
</compile_context>

<pallas_src>
import functools

import jax
import jax.numpy as jnp
from jax import lax
from jax.experimental import pallas as pl
from jax.experimental.pallas import tpu as pltpu


def _make_attention_kernel(num_heads: int, head_dim: int, dim: int):
    scale = float(head_dim) ** -0.5

    def kernel(x_ref, wqkv_ref, wproj_ref, bproj_ref, o_ref):
        # x_ref block: (N, C) in bf16 (leading batch dim squeezed by BlockSpec)
        n_tokens = x_ref.shape[0]

        # QKV projection on the MXU: bf16 x bf16 -> f32 accum, (N, 3C)
        qkv = jnp.dot(x_ref[...], wqkv_ref[...],
                      preferred_element_type=jnp.float32)

        w_proj = wproj_ref[...]                      # (C, C) bf16

        acc = jnp.zeros((n_tokens, dim), jnp.float32)
        for h in range(num_heads):                   # small static head loop
            lo = h * head_dim
            hi = lo + head_dim
            qh = (qkv[:, lo:hi] * scale).astype(jnp.bfloat16)            # (N, D)
            kh = qkv[:, dim + lo:dim + hi].astype(jnp.bfloat16)          # (N, D)
            vh = qkv[:, 2 * dim + lo:2 * dim + hi].astype(jnp.bfloat16)  # (N, D)

            # scores (N, N): contract D on both operands (no explicit .T)
            s = lax.dot_general(qh, kh, (((1,), (1,)), ((), ())),
                                preferred_element_type=jnp.float32)

            # numerically stable softmax, kept entirely in f32
            s = s - jnp.max(s, axis=-1, keepdims=True)
            p = jnp.exp(s)
            p = p * pl.reciprocal(jnp.sum(p, axis=-1, keepdims=True),
                                  approx=True)

            # context (N, D), then fold into the output projection:
            # concat_h(ctx_h) @ w_proj == sum_h ctx_h @ w_proj[hD:(h+1)D, :]
            ctx_h = jnp.dot(p.astype(jnp.bfloat16), vh,
                            preferred_element_type=jnp.float32)
            acc = acc + jnp.dot(ctx_h.astype(jnp.bfloat16), w_proj[lo:hi, :],
                                preferred_element_type=jnp.float32)

        out = acc + bproj_ref[...]                   # (1, C) bias broadcast
        o_ref[...] = out.astype(o_ref.dtype)

    return kernel


@functools.partial(jax.jit, static_argnames=("num_heads",))
def sdp_attention(x, w_qkv, w_proj, b_proj, *, num_heads: int):
    """x: (B, N, C). Returns (B, N, C) with x.dtype."""
    B, N, C = x.shape
    assert C % num_heads == 0
    D = C // num_heads
    kernel = _make_attention_kernel(num_heads, D, C)

    # MXU-friendly operand dtypes (accumulation stays f32 inside the kernel).
    xb = x.astype(jnp.bfloat16)
    wqkvb = w_qkv.astype(jnp.bfloat16)
    wprojb = w_proj.astype(jnp.bfloat16)
    bprojf = b_proj.astype(jnp.float32)

    flops = B * (2 * N * C * 3 * C              # qkv projection
                 + 4 * num_heads * N * N * D    # scores + context
                 + 2 * N * C * C)               # output projection
    bytes_accessed = (xb.size * 2 + wqkvb.size * 2 + wprojb.size * 2
                      + bprojf.size * 4 + B * N * C * x.dtype.itemsize)

    return pl.pallas_call(
        kernel,
        out_shape=jax.ShapeDtypeStruct((B, N, C), x.dtype),
        grid_spec=pltpu.PrefetchScalarGridSpec(
            num_scalar_prefetch=0,
            grid=(B,),                                           # one step / batch
            in_specs=[
                pl.BlockSpec((None, N, C), lambda b: (b, 0, 0)),  # x (batch squeezed)
                # TODO(synk): at real DINOv2 scale (C>=768, N>=257), single-buffer
                # these grid-invariant weights (pipeline_mode=pl.Buffered(1)) and
                # add a "parallel" query-tile grid axis so the resident score tile
                # is (tq, N) instead of (N, N) — needed for v7x's 64 MiB VMEM and
                # to feed both of its TensorCores at small batch.
                pl.BlockSpec((C, 3 * C), lambda b: (0, 0)),       # w_qkv
                pl.BlockSpec((C, C), lambda b: (0, 0)),           # w_proj
                pl.BlockSpec((1, C), lambda b: (0, 0)),           # b_proj
            ],
            out_specs=pl.BlockSpec((None, N, C), lambda b: (b, 0, 0)),
        ),
        compiler_params=pltpu.CompilerParams(
            dimension_semantics=("parallel",),
            vmem_limit_bytes=64 * 1024 * 1024,
        ),
        cost_estimate=pl.CostEstimate(
            flops=flops,
            transcendentals=B * num_heads * N * N,
            bytes_accessed=bytes_accessed,
        ),
    )(xb, wqkvb, wprojb, bprojf)


def _reference(x, w_qkv, w_proj, b_proj, num_heads):
    """Pure-JAX f32 reference mirroring the PyTorch forward (eval mode)."""
    B, N, C = x.shape
    D = C // num_heads
    scale = D ** -0.5
    qkv = (x @ w_qkv).reshape(B, N, 3, num_heads, D).transpose(2, 0, 3, 1, 4)
    q, k, v = qkv[0] * scale, qkv[1], qkv[2]          # (B, H, N, D)
    attn = jax.nn.softmax(q @ jnp.swapaxes(k, -2, -1), axis=-1)
    out = (attn @ v).transpose(0, 2, 1, 3).reshape(B, N, C)
    return out @ w_proj + b_proj[0]


if __name__ == "__main__":
    # Small shapes consistent with the module: lane-dense C (multiple of 128),
    # module-default num_heads=8 -> head_dim=16, seq N=16, batch B=2.
    B, N, C = 2, 16, 128
    num_heads = 8

    key = jax.random.PRNGKey(0)
    kx, kq, kp, kb = jax.random.split(key, 4)

    x = jax.random.normal(kx, (B, N, C), dtype=jnp.float32)

    # Deterministic synthetic parameters (nn.Linear-style uniform init).
    bound = 1.0 / (C ** 0.5)
    w_qkv = jax.random.uniform(kq, (C, 3 * C), minval=-bound, maxval=bound,
                               dtype=jnp.float32)
    w_proj = jax.random.uniform(kp, (C, C), minval=-bound, maxval=bound,
                                dtype=jnp.float32)
    b_proj = jax.random.uniform(kb, (1, C), minval=-bound, maxval=bound,
                                dtype=jnp.float32)

    out = sdp_attention(x, w_qkv, w_proj, b_proj, num_heads=num_heads)
    out = jax.block_until_ready(out)

    ref = _reference(x, w_qkv, w_proj, b_proj, num_heads)
    assert out.shape == (B, N, C)
    # bf16 MXU operands (f32 accumulation) -> relaxed tolerance vs the f32 ref.
    err = jnp.max(jnp.abs(out - ref))
    assert jnp.allclose(out, ref, atol=3e-2, rtol=3e-2), f"mismatch, max|diff|={err}"

    # TODO(synk): attn_drop / proj_drop are identity in eval mode; the optional
    # attention_weights field of AttentionOutput is not materialized.
    print("KERNEL_OK")
</pallas_src>

<mosaic_0001>
module attributes {stable_mosaic.version = 11 : i64} {
  func.func @kernel(%arg0: i32, %arg1: memref<1x16x128xbf16, #tpu.memory_space<vmem>>, %arg2: memref<128x384xbf16, #tpu.memory_space<vmem>>, %arg3: memref<128x128xbf16, #tpu.memory_space<vmem>>, %arg4: memref<1x128xf32, #tpu.memory_space<vmem>>, %arg5: memref<1x16x128xf32, #tpu.memory_space<vmem>>) attributes {dimension_semantics = [#tpu.dimension_semantics<parallel>], iteration_bounds = array<i64: 2>, scalar_prefetch = 0 : i64, scratch_operands = 0 : i64, tpu.core_type = #tpu.core_type<tc>, window_params = [{transform_indices = @transform_0, window_bounds = array<i64: 1, 16, 128>}, {pipeline_mode = #tpu.pipeline_mode<synchronous>, transform_indices = @transform_1, window_bounds = array<i64: 128, 384>}, {pipeline_mode = #tpu.pipeline_mode<synchronous>, transform_indices = @transform_2, window_bounds = array<i64: 128, 128>}, {pipeline_mode = #tpu.pipeline_mode<synchronous>, transform_indices = @transform_3, window_bounds = array<i64: 1, 128>}, {transform_indices = @transform_4, window_bounds = array<i64: 1, 16, 128>}]} {
    %c0 = arith.constant 0 : index
    %c0_0 = arith.constant 0 : index
    %c0_1 = arith.constant 0 : index
    %0 = vector.load %arg1[%c0, %c0_0, %c0_1] : memref<1x16x128xbf16, #tpu.memory_space<vmem>>, vector<1x16x128xbf16>
    %1 = vector.shape_cast %0 : vector<1x16x128xbf16> to vector<16x128xbf16>
    %c0_2 = arith.constant 0 : index
    %c0_3 = arith.constant 0 : index
    %2 = vector.load %arg2[%c0_2, %c0_3] : memref<128x384xbf16, #tpu.memory_space<vmem>>, vector<128x384xbf16>
    %cst = arith.constant dense<0.000000e+00> : vector<16x384xf32>
    %3 = tpu.matmul %1, %2, %cst {dimension_numbers = #tpu.dot_dimension_numbers<[1], [0], [0], [1], [0, 0, 1, 1], [], []>} : vector<16x128xbf16>, vector<128x384xbf16>, vector<16x384xf32> -> vector<16x384xf32>
    %c0_4 = arith.constant 0 : index
    %c0_5 = arith.constant 0 : index
    %4 = vector.load %arg3[%c0_4, %c0_5] : memref<128x128xbf16, #tpu.memory_space<vmem>>, vector<128x128xbf16>
    %cst_6 = arith.constant 0.000000e+00 : f32
    %5 = vector.broadcast %cst_6 : f32 to vector<16x128xf32>
    %6 = vector.extract_strided_slice %3 {offsets = [0, 0], sizes = [16, 16], strides = [1, 1]} : vector<16x384xf32> to vector<16x16xf32>
    %cst_7 = arith.constant 2.500000e-01 : f32
    %7 = vector.broadcast %cst_7 : f32 to vector<16x16xf32>
    %8 = arith.mulf %6, %7 : vector<16x16xf32>
    %9 = arith.truncf %8 : vector<16x16xf32> to vector<16x16xbf16>
    %10 = vector.extract_strided_slice %3 {offsets = [0, 128], sizes = [16, 16], strides = [1, 1]} : vector<16x384xf32> to vector<16x16xf32>
    %11 = arith.truncf %10 : vector<16x16xf32> to vector<16x16xbf16>
    %12 = vector.extract_strided_slice %3 {offsets = [0, 256], sizes = [16, 16], strides = [1, 1]} : vector<16x384xf32> to vector<16x16xf32>
    %13 = arith.truncf %12 : vector<16x16xf32> to vector<16x16xbf16>
    %cst_8 = arith.constant dense<0.000000e+00> : vector<16x16xf32>
    %14 = tpu.matmul %9, %11, %cst_8 {dimension_numbers = #tpu.dot_dimension_numbers<[1], [1], [0], [0], [0, 0, 1, 0], [], []>} : vector<16x16xbf16>, vector<16x16xbf16>, vector<16x16xf32> -> vector<16x16xf32>
    %cst_9 = arith.constant dense<0xFF800000> : vector<16xf32>
    %15 = vector.multi_reduction <maximumf>, %14, %cst_9 [1] : vector<16x16xf32> to vector<16xf32>
    %16 = vector.shape_cast %15 : vector<16xf32> to vector<16x1xf32>
    %17 = vector.broadcast %16 : vector<16x1xf32> to vector<16x16xf32>
    %18 = arith.subf %14, %17 : vector<16x16xf32>
    %19 = math.exp %18 : vector<16x16xf32>
    %cst_10 = arith.constant dense<0.000000e+00> : vector<16xf32>
    %20 = vector.multi_reduction <add>, %19, %cst_10 [1] : vector<16x16xf32> to vector<16xf32>
    %21 = vector.shape_cast %20 : vector<16xf32> to vector<16x1xf32>
    %22 = tpu.reciprocal %21 {approx = true} : vector<16x1xf32> -> vector<16x1xf32>
    %23 = vector.broadcast %22 : vector<16x1xf32> to vector<16x16xf32>
    %24 = arith.mulf %19, %23 : vector<16x16xf32>
    %25 = arith.truncf %24 : vector<16x16xf32> to vector<16x16xbf16>
    %cst_11 = arith.constant dense<0.000000e+00> : vector<16x16xf32>
    %26 = tpu.matmul %25, %13, %cst_11 {dimension_numbers = #tpu.dot_dimension_numbers<[1], [0], [0], [1], [0, 0, 1, 1], [], []>} : vector<16x16xbf16>, vector<16x16xbf16>, vector<16x16xf32> -> vector<16x16xf32>
    %27 = arith.truncf %26 : vector<16x16xf32> to vector<16x16xbf16>
    %28 = vector.extract_strided_slice %4 {offsets = [0, 0], sizes = [16, 128], strides = [1, 1]} : vector<128x128xbf16> to vector<16x128xbf16>
    %cst_12 = arith.constant dense<0.000000e+00> : vector<16x128xf32>
    %29 = tpu.matmul %27, %28, %cst_12 {dimension_numbers = #tpu.dot_dimension_numbers<[1], [0], [0], [1], [0, 0, 1, 1], [], []>} : vector<16x16xbf16>, vector<16x128xbf16>, vector<16x128xf32> -> vector<16x128xf32>
    %30 = arith.addf %5, %29 : vector<16x128xf32>
    %31 = vector.extract_strided_slice %3 {offsets = [0, 16], sizes = [16, 16], strides = [1, 1]} : vector<16x384xf32> to vector<16x16xf32>
    %cst_13 = arith.constant 2.500000e-01 : f32
    %32 = vector.broadcast %cst_13 : f32 to vector<16x16xf32>
    %33 = arith.mulf %31, %32 : vector<16x16xf32>
    %34 = arith.truncf %33 : vector<16x16xf32> to vector<16x16xbf16>
    %35 = vector.extract_strided_slice %3 {offsets = [0, 144], sizes = [16, 16], strides = [1, 1]} : vector<16x384xf32> to vector<16x16xf32>
    %36 = arith.truncf %35 : vector<16x16xf32> to vector<16x16xbf16>
    %37 = vector.extract_strided_slice %3 {offsets = [0, 272], sizes = [16, 16], strides = [1, 1]} : vector<16x384xf32> to vector<16x16xf32>
    %38 = arith.truncf %37 : vector<16x16xf32> to vector<16x16xbf16>
    %cst_14 = arith.constant dense<0.000000e+00> : vector<16x16xf32>
    %39 = tpu.matmul %34, %36, %cst_14 {dimension_numbers = #tpu.dot_dimension_numbers<[1], [1], [0], [0], [0, 0, 1, 0], [], []>} : vector<16x16xbf16>, vector<16x16xbf16>, vector<16x16xf32> -> vector<16x16xf32>
    %cst_15 = arith.constant dense<0xFF800000> : vector<16xf32>
    %40 = vector.multi_reduction <maximumf>, %39, %cst_15 [1] : vector<16x16xf32> to vector<16xf32>
    %41 = vector.shape_cast %40 : vector<16xf32> to vector<16x1xf32>
    %42 = vector.broadcast %41 : vector<16x1xf32> to vector<16x16xf32>
    %43 = arith.subf %39, %42 : vector<16x16xf32>
    %44 = math.exp %43 : vector<16x16xf32>
    %cst_16 = arith.constant dense<0.000000e+00> : vector<16xf32>
    %45 = vector.multi_reduction <add>, %44, %cst_16 [1] : vector<16x16xf32> to vector<16xf32>
    %46 = vector.shape_cast %45 : vector<16xf32> to vector<16x1xf32>
    %47 = tpu.reciprocal %46 {approx = true} : vector<16x1xf32> -> vector<16x1xf32>
    %48 = vector.broadcast %47 : vector<16x1xf32> to vector<16x16xf32>
    %49 = arith.mulf %44, %48 : vector<16x16xf32>
    %50 = arith.truncf %49 : vector<16x16xf32> to vector<16x16xbf16>
    %cst_17 = arith.constant dense<0.000000e+00> : vector<16x16xf32>
    %51 = tpu.matmul %50, %38, %cst_17 {dimension_numbers = #tpu.dot_dimension_numbers<[1], [0], [0], [1], [0, 0, 1, 1], [], []>} : vector<16x16xbf16>, vector<16x16xbf16>, vector<16x16xf32> -> vector<16x16xf32>
    %52 = arith.truncf %51 : vector<16x16xf32> to vector<16x16xbf16>
    %53 = vector.extract_strided_slice %4 {offsets = [16, 0], sizes = [16, 128], strides = [1, 1]} : vector<128x128xbf16> to vector<16x128xbf16>
    %cst_18 = arith.constant dense<0.000000e+00> : vector<16x128xf32>
    %54 = tpu.matmul %52, %53, %cst_18 {dimension_numbers = #tpu.dot_dimension_numbers<[1], [0], [0], [1], [0, 0, 1, 1], [], []>} : vector<16x16xbf16>, vector<16x128xbf16>, vector<16x128xf32> -> vector<16x128xf32>
    %55 = arith.addf %30, %54 : vector<16x128xf32>
    %56 = vector.extract_strided_slice %3 {offsets = [0, 32], sizes = [16, 16], strides = [1, 1]} : vector<16x384xf32> to vector<16x16xf32>
    %cst_19 = arith.constant 2.500000e-01 : f32
    %57 = vector.broadcast %cst_19 : f32 to vector<16x16xf32>
    %58 = arith.mulf %56, %57 : vector<16x16xf32>
    %59 = arith.truncf %58 : vector<16x16xf32> to vector<16x16xbf16>
    %60 = vector.extract_strided_slice %3 {offsets = [0, 160], sizes = [16, 16], strides = [1, 1]} : vector<16x384xf32> to vector<16x16xf32>
    %61 = arith.truncf %60 : vector<16x16xf32> to vector<16x16xbf16>
    %62 = vector.extract_strided_slice %3 {offsets = [0, 288], sizes = [16, 16], strides = [1, 1]} : vector<16x384xf32> to vector<16x16xf32>
    %63 = arith.truncf %62 : vector<16x16xf32> to vector<16x16xbf16>
    %cst_20 = arith.constant dense<0.000000e+00> : vector<16x16xf32>
    %64 = tpu.matmul %59, %61, %cst_20 {dimension_numbers = #tpu.dot_dimension_numbers<[1], [1], [0], [0], [0, 0, 1, 0], [], []>} : vector<16x16xbf16>, vector<16x16xbf16>, vector<16x16xf32> -> vector<16x16xf32>
    %cst_21 = arith.constant dense<0xFF800000> : vector<16xf32>
    %65 = vector.multi_reduction <maximumf>, %64, %cst_21 [1] : vector<16x16xf32> to vector<16xf32>
    %66 = vector.shape_cast %65 : vector<16xf32> to vector<16x1xf32>
    %67 = vector.broadcast %66 : vector<16x1xf32> to vector<16x16xf32>
    %68 = arith.subf %64, %67 : vector<16x16xf32>
    %69 = math.exp %68 : vector<16x16xf32>
    %cst_22 = arith.constant dense<0.000000e+00> : vector<16xf32>
    %70 = vector.multi_reduction <add>, %69, %cst_22 [1] : vector<16x16xf32> to vector<16xf32>
    %71 = vector.shape_cast %70 : vector<16xf32> to vector<16x1xf32>
    %72 = tpu.reciprocal %71 {approx = true} : vector<16x1xf32> -> vector<16x1xf32>
    %73 = vector.broadcast %72 : vector<16x1xf32> to vector<16x16xf32>
    %74 = arith.mulf %69, %73 : vector<16x16xf32>
    %75 = arith.truncf %74 : vector<16x16xf32> to vector<16x16xbf16>
    %cst_23 = arith.constant dense<0.000000e+00> : vector<16x16xf32>
    %76 = tpu.matmul %75, %63, %cst_23 {dimension_numbers = #tpu.dot_dimension_numbers<[1], [0], [0], [1], [0, 0, 1, 1], [], []>} : vector<16x16xbf16>, vector<16x16xbf16>, vector<16x16xf32> -> vector<16x16xf32>
    %77 = arith.truncf %76 : vector<16x16xf32> to vector<16x16xbf16>
    %78 = vector.extract_strided_slice %4 {offsets = [32, 0], sizes = [16, 128], strides = [1, 1]} : vector<128x128xbf16> to vector<16x128xbf16>
    %cst_24 = arith.constant dense<0.000000e+00> : vector<16x128xf32>
    %79 = tpu.matmul %77, %78, %cst_24 {dimension_numbers = #tpu.dot_dimension_numbers<[1], [0], [0], [1], [0, 0, 1, 1], [], []>} : vector<16x16xbf16>, vector<16x128xbf16>, vector<16x128xf32> -> vector<16x128xf32>
    %80 = arith.addf %55, %79 : vector<16x128xf32>
    %81 = vector.extract_strided_slice %3 {offsets = [0, 48], sizes = [16, 16], strides = [1, 1]} : vector<16x384xf32> to vector<16x16xf32>
    %cst_25 = arith.constant 2.500000e-01 : f32
    %82 = vector.broadcast %cst_25 : f32 to vector<16x16xf32>
    %83 = arith.mulf %81, %82 : vector<16x16xf32>
    %84 = arith.truncf %83 : vector<16x16xf32> to vector<16x16xbf16>
    %85 = vector.extract_strided_slice %3 {offsets = [0, 176], sizes = [16, 16], strides = [1, 1]} : vector<16x384xf32> to vector<16x16xf32>
    %86 = arith.truncf %85 : vector<16x16xf32> to vector<16x16xbf16>
    %87 = vector.extract_strided_slice %3 {offsets = [0, 304], sizes = [16, 16], strides = [1, 1]} : vector<16x384xf32> to vector<16x16xf32>
    %88 = arith.truncf %87 : vector<16x16xf32> to vector<16x16xbf16>
    %cst_26 = arith.constant dense<0.000000e+00> : vector<16x16xf32>
    %89 = tpu.matmul %84, %86, %cst_26 {dimension_numbers = #tpu.dot_dimension_numbers<[1], [1], [0], [0], [0, 0, 1, 0], [], []>} : vector<16x16xbf16>, vector<16x16xbf16>, vector<16x16xf32> -> vector<16x16xf32>
    %cst_27 = arith.constant dense<0xFF800000> : vector<16xf32>
    %90 = vector.multi_reduction <maximumf>, %89, %cst_27 [1] : vector<16x16xf32> to vector<16xf32>
    %91 = vector.shape_cast %90 : vector<16xf32> to vector<16x1xf32>
    %92 = vector.broadcast %91 : vector<16x1xf32> to vector<16x16xf32>
    %93 = arith.subf %89, %92 : vector<16x16xf32>
    %94 = math.exp %93 : vector<16x16xf32>
    %cst_28 = arith.constant dense<0.000000e+00> : vector<16xf32>
    %95 = vector.multi_reduction <add>, %94, %cst_28 [1] : vector<16x16xf32> to vector<16xf32>
    %96 = vector.shape_cast %95 : vector<16xf32> to vector<16x1xf32>
    %97 = tpu.reciprocal %96 {approx = true} : vector<16x1xf32> -> vector<16x1xf32>
    %98 = vector.broadcast %97 : vector<16x1xf32> to vector<16x16xf32>
    %99 = arith.mulf %94, %98 : vector<16x16xf32>
    %100 = arith.truncf %99 : vector<16x16xf32> to vector<16x16xbf16>
    %cst_29 = arith.constant dense<0.000000e+00> : vector<16x16xf32>
    %101 = tpu.matmul %100, %88, %cst_29 {dimension_numbers = #tpu.dot_dimension_numbers<[1], [0], [0], [1], [0, 0, 1, 1], [], []>} : vector<16x16xbf16>, vector<16x16xbf16>, vector<16x16xf32> -> vector<16x16xf32>
    %102 = arith.truncf %101 : vector<16x16xf32> to vector<16x16xbf16>
    %103 = vector.extract_strided_slice %4 {offsets = [48, 0], sizes = [16, 128], strides = [1, 1]} : vector<128x128xbf16> to vector<16x128xbf16>
    %cst_30 = arith.constant dense<0.000000e+00> : vector<16x128xf32>
    %104 = tpu.matmul %102, %103, %cst_30 {dimension_numbers = #tpu.dot_dimension_numbers<[1], [0], [0], [1], [0, 0, 1, 1], [], []>} : vector<16x16xbf16>, vector<16x128xbf16>, vector<16x128xf32> -> vector<16x128xf32>
    %105 = arith.addf %80, %104 : vector<16x128xf32>
    %106 = vector.extract_strided_slice %3 {offsets = [0, 64], sizes = [16, 16], strides = [1, 1]} : vector<16x384xf32> to vector<16x16xf32>
    %cst_31 = arith.constant 2.500000e-01 : f32
    %107 = vector.broadcast %cst_31 : f32 to vector<16x16xf32>
    %108 = arith.mulf %106, %107 : vector<16x16xf32>
    %109 = arith.truncf %108 : vector<16x16xf32> to vector<16x16xbf16>
    %110 = vector.extract_strided_slice %3 {offsets = [0, 192], sizes = [16, 16], strides = [1, 1]} : vector<16x384xf32> to vector<16x16xf32>
    %111 = arith.truncf %110 : vector<16x16xf32> to vector<16x16xbf16>
    %112 = vector.extract_strided_slice %3 {offsets = [0, 320], sizes = [16, 16], strides = [1, 1]} : vector<16x384xf32> to vector<16x16xf32>
    %113 = arith.truncf %112 : vector<16x16xf32> to vector<16x16xbf16>
    %cst_32 = arith.constant dense<0.000000e+00> : vector<16x16xf32>
    %114 = tpu.matmul %109, %111, %cst_32 {dimension_numbers = #tpu.dot_dimension_numbers<[1], [1], [0], [0], [0, 0, 1, 0], [], []>} : vector<16x16xbf16>, vector<16x16xbf16>, vector<16x16xf32> -> vector<16x16xf32>
    %cst_33 = arith.constant dense<0xFF800000> : vector<16xf32>
    %115 = vector.multi_reduction <maximumf>, %114, %cst_33 [1] : vector<16x16xf32> to vector<16xf32>
    %116 = vector.shape_cast %115 : vector<16xf32> to vector<16x1xf32>
    %117 = vector.broadcast %116 : vector<16x1xf32> to vector<16x16xf32>
    %118 = arith.subf %114, %117 : vector<16x16xf32>
    %119 = math.exp %118 : vector<16x16xf32>
    %cst_34 = arith.constant dense<0.000000e+00> : vector<16xf32>
    %120 = vector.multi_reduction <add>, %119, %cst_34 [1] : vector<16x16xf32> to vector<16xf32>
    %121 = vector.shape_cast %120 : vector<16xf32> to vector<16x1xf32>
    %122 = tpu.reciprocal %121 {approx = true} : vector<16x1xf32> -> vector<16x1xf32>
    %123 = vector.broadcast %122 : vector<16x1xf32> to vector<16x16xf32>
    %124 = arith.mulf %119, %123 : vector<16x16xf32>
    %125 = arith.truncf %124 : vector<16x16xf32> to vector<16x16xbf16>
    %cst_35 = arith.constant dense<0.000000e+00> : vector<16x16xf32>
    %126 = tpu.matmul %125, %113, %cst_35 {dimension_numbers = #tpu.dot_dimension_numbers<[1], [0], [0], [1], [0, 0, 1, 1], [], []>} : vector<16x16xbf16>, vector<16x16xbf16>, vector<16x16xf32> -> vector<16x16xf32>
    %127 = arith.truncf %126 : vector<16x16xf32> to vector<16x16xbf16>
    %128 = vector.extract_strided_slice %4 {offsets = [64, 0], sizes = [16, 128], strides = [1, 1]} : vector<128x128xbf16> to vector<16x128xbf16>
    %cst_36 = arith.constant dense<0.000000e+00> : vector<16x128xf32>
    %129 = tpu.matmul %127, %128, %cst_36 {dimension_numbers = #tpu.dot_dimension_numbers<[1], [0], [0], [1], [0, 0, 1, 1], [], []>} : vector<16x16xbf16>, vector<16x128xbf16>, vector<16x128xf32> -> vector<16x128xf32>
    %130 = arith.addf %105, %129 : vector<16x128xf32>
    %131 = vector.extract_strided_slice %3 {offsets = [0, 80], sizes = [16, 16], strides = [1, 1]} : vector<16x384xf32> to vector<16x16xf32>
    %cst_37 = arith.constant 2.500000e-01 : f32
    %132 = vector.broadcast %cst_37 : f32 to vector<16x16xf32>
    %133 = arith.mulf %131, %132 : vector<16x16xf32>
    %134 = arith.truncf %133 : vector<16x16xf32> to vector<16x16xbf16>
    %135 = vector.extract_strided_slice %3 {offsets = [0, 208], sizes = [16, 16], strides = [1, 1]} : vector<16x384xf32> to vector<16x16xf32>
    %136 = arith.truncf %135 : vector<16x16xf32> to vector<16x16xbf16>
    %137 = vector.extract_strided_slice %3 {offsets = [0, 336], sizes = [16, 16], strides = [1, 1]} : vector<16x384xf32> to vector<16x16xf32>
    %138 = arith.truncf %137 : vector<16x16xf32> to vector<16x16xbf16>
    %cst_38 = arith.constant dense<0.000000e+00> : vector<16x16xf32>
    %139 = tpu.matmul %134, %136, %cst_38 {dimension_numbers = #tpu.dot_dimension_numbers<[1], [1], [0], [0], [0, 0, 1, 0], [], []>} : vector<16x16xbf16>, vector<16x16xbf16>, vector<16x16xf32> -> vector<16x16xf32>
    %cst_39 = arith.constant dense<0xFF800000> : vector<16xf32>
    %140 = vector.multi_reduction <maximumf>, %139, %cst_39 [1] : vector<16x16xf32> to vector<16xf32>
    %141 = vector.shape_cast %140 : vector<16xf32> to vector<16x1xf32>
    %142 = vector.broadcast %141 : vector<16x1xf32> to vector<16x16xf32>
    %143 = arith.subf %139, %142 : vector<16x16xf32>
    %144 = math.exp %143 : vector<16x16xf32>
    %cst_40 = arith.constant dense<0.000000e+00> : vector<16xf32>
    %145 = vector.multi_reduction <add>, %144, %cst_40 [1] : vector<16x16xf32> to vector<16xf32>
    %146 = vector.shape_cast %145 : vector<16xf32> to vector<16x1xf32>
    %147 = tpu.reciprocal %146 {approx = true} : vector<16x1xf32> -> vector<16x1xf32>
    %148 = vector.broadcast %147 : vector<16x1xf32> to vector<16x16xf32>
    %149 = arith.mulf %144, %148 : vector<16x16xf32>
    %150 = arith.truncf %149 : vector<16x16xf32> to vector<16x16xbf16>
    %cst_41 = arith.constant dense<0.000000e+00> : vector<16x16xf32>
    %151 = tpu.matmul %150, %138, %cst_41 {dimension_numbers = #tpu.dot_dimension_numbers<[1], [0], [0], [1], [0, 0, 1, 1], [], []>} : vector<16x16xbf16>, vector<16x16xbf16>, vector<16x16xf32> -> vector<16x16xf32>
    %152 = arith.truncf %151 : vector<16x16xf32> to vector<16x16xbf16>
    %153 = vector.extract_strided_slice %4 {offsets = [80, 0], sizes = [16, 128], strides = [1, 1]} : vector<128x128xbf16> to vector<16x128xbf16>
    %cst_42 = arith.constant dense<0.000000e+00> : vector<16x128xf32>
    %154 = tpu.matmul %152, %153, %cst_42 {dimension_numbers = #tpu.dot_dimension_numbers<[1], [0], [0], [1], [0, 0, 1, 1], [], []>} : vector<16x16xbf16>, vector<16x128xbf16>, vector<16x128xf32> -> vector<16x128xf32>
    %155 = arith.addf %130, %154 : vector<16x128xf32>
    %156 = vector.extract_strided_slice %3 {offsets = [0, 96], sizes = [16, 16], strides = [1, 1]} : vector<16x384xf32> to vector<16x16xf32>
    %cst_43 = arith.constant 2.500000e-01 : f32
    %157 = vector.broadcast %cst_43 : f32 to vector<16x16xf32>
    %158 = arith.mulf %156, %157 : vector<16x16xf32>
    %159 = arith.truncf %158 : vector<16x16xf32> to vector<16x16xbf16>
    %160 = vector.extract_strided_slice %3 {offsets = [0, 224], sizes = [16, 16], strides = [1, 1]} : vector<16x384xf32> to vector<16x16xf32>
    %161 = arith.truncf %160 : vector<16x16xf32> to vector<16x16xbf16>
    %162 = vector.extract_strided_slice %3 {offsets = [0, 352], sizes = [16, 16], strides = [1, 1]} : vector<16x384xf32> to vector<16x16xf32>
    %163 = arith.truncf %162 : vector<16x16xf32> to vector<16x16xbf16>
    %cst_44 = arith.constant dense<0.000000e+00> : vector<16x16xf32>
    %164 = tpu.matmul %159, %161, %cst_44 {dimension_numbers = #tpu.dot_dimension_numbers<[1], [1], [0], [0], [0, 0, 1, 0], [], []>} : vector<16x16xbf16>, vector<16x16xbf16>, vector<16x16xf32> -> vector<16x16xf32>
    %cst_45 = arith.constant dense<0xFF800000> : vector<16xf32>
    %165 = vector.multi_reduction <maximumf>, %164, %cst_45 [1] : vector<16x16xf32> to vector<16xf32>
    %166 = vector.shape_cast %165 : vector<16xf32> to vector<16x1xf32>
    %167 = vector.broadcast %166 : vector<16x1xf32> to vector<16x16xf32>
    %168 = arith.subf %164, %167 : vector<16x16xf32>
    %169 = math.exp %168 : vector<16x16xf32>
    %cst_46 = arith.constant dense<0.000000e+00> : vector<16xf32>
    %170 = vector.multi_reduction <add>, %169, %cst_46 [1] : vector<16x16xf32> to vector<16xf32>
    %171 = vector.shape_cast %170 : vector<16xf32> to vector<16x1xf32>
    %172 = tpu.reciprocal %171 {approx = true} : vector<16x1xf32> -> vector<16x1xf32>
    %173 = vector.broadcast %172 : vector<16x1xf32> to vector<16x16xf32>
    %174 = arith.mulf %169, %173 : vector<16x16xf32>
    %175 = arith.truncf %174 : vector<16x16xf32> to vector<16x16xbf16>
    %cst_47 = arith.constant dense<0.000000e+00> : vector<16x16xf32>
    %176 = tpu.matmul %175, %163, %cst_47 {dimension_numbers = #tpu.dot_dimension_numbers<[1], [0], [0], [1], [0, 0, 1, 1], [], []>} : vector<16x16xbf16>, vector<16x16xbf16>, vector<16x16xf32> -> vector<16x16xf32>
    %177 = arith.truncf %176 : vector<16x16xf32> to vector<16x16xbf16>
    %178 = vector.extract_strided_slice %4 {offsets = [96, 0], sizes = [16, 128], strides = [1, 1]} : vector<128x128xbf16> to vector<16x128xbf16>
    %cst_48 = arith.constant dense<0.000000e+00> : vector<16x128xf32>
    %179 = tpu.matmul %177, %178, %cst_48 {dimension_numbers = #tpu.dot_dimension_numbers<[1], [0], [0], [1], [0, 0, 1, 1], [], []>} : vector<16x16xbf16>, vector<16x128xbf16>, vector<16x128xf32> -> vector<16x128xf32>
    %180 = arith.addf %155, %179 : vector<16x128xf32>
    %181 = vector.extract_strided_slice %3 {offsets = [0, 112], sizes = [16, 16], strides = [1, 1]} : vector<16x384xf32> to vector<16x16xf32>
    %cst_49 = arith.constant 2.500000e-01 : f32
    %182 = vector.broadcast %cst_49 : f32 to vector<16x16xf32>
    %183 = arith.mulf %181, %182 : vector<16x16xf32>
    %184 = arith.truncf %183 : vector<16x16xf32> to vector<16x16xbf16>
    %185 = vector.extract_strided_slice %3 {offsets = [0, 240], sizes = [16, 16], strides = [1, 1]} : vector<16x384xf32> to vector<16x16xf32>
    %186 = arith.truncf %185 : vector<16x16xf32> to vector<16x16xbf16>
    %187 = vector.extract_strided_slice %3 {offsets = [0, 368], sizes = [16, 16], strides = [1, 1]} : vector<16x384xf32> to vector<16x16xf32>
    %188 = arith.truncf %187 : vector<16x16xf32> to vector<16x16xbf16>
    %cst_50 = arith.constant dense<0.000000e+00> : vector<16x16xf32>
    %189 = tpu.matmul %184, %186, %cst_50 {dimension_numbers = #tpu.dot_dimension_numbers<[1], [1], [0], [0], [0, 0, 1, 0], [], []>} : vector<16x16xbf16>, vector<16x16xbf16>, vector<16x16xf32> -> vector<16x16xf32>
    %cst_51 = arith.constant dense<0xFF800000> : vector<16xf32>
    %190 = vector.multi_reduction <maximumf>, %189, %cst_51 [1] : vector<16x16xf32> to vector<16xf32>
    %191 = vector.shape_cast %190 : vector<16xf32> to vector<16x1xf32>
    %192 = vector.broadcast %191 : vector<16x1xf32> to vector<16x16xf32>
    %193 = arith.subf %189, %192 : vector<16x16xf32>
    %194 = math.exp %193 : vector<16x16xf32>
    %cst_52 = arith.constant dense<0.000000e+00> : vector<16xf32>
    %195 = vector.multi_reduction <add>, %194, %cst_52 [1] : vector<16x16xf32> to vector<16xf32>
    %196 = vector.shape_cast %195 : vector<16xf32> to vector<16x1xf32>
    %197 = tpu.reciprocal %196 {approx = true} : vector<16x1xf32> -> vector<16x1xf32>
    %198 = vector.broadcast %197 : vector<16x1xf32> to vector<16x16xf32>
    %199 = arith.mulf %194, %198 : vector<16x16xf32>
    %200 = arith.truncf %199 : vector<16x16xf32> to vector<16x16xbf16>
    %cst_53 = arith.constant dense<0.000000e+00> : vector<16x16xf32>
    %201 = tpu.matmul %200, %188, %cst_53 {dimension_numbers = #tpu.dot_dimension_numbers<[1], [0], [0], [1], [0, 0, 1, 1], [], []>} : vector<16x16xbf16>, vector<16x16xbf16>, vector<16x16xf32> -> vector<16x16xf32>
    %202 = arith.truncf %201 : vector<16x16xf32> to vector<16x16xbf16>
    %203 = vector.extract_strided_slice %4 {offsets = [112, 0], sizes = [16, 128], strides = [1, 1]} : vector<128x128xbf16> to vector<16x128xbf16>
    %cst_54 = arith.constant dense<0.000000e+00> : vector<16x128xf32>
    %204 = tpu.matmul %202, %203, %cst_54 {dimension_numbers = #tpu.dot_dimension_numbers<[1], [0], [0], [1], [0, 0, 1, 1], [], []>} : vector<16x16xbf16>, vector<16x128xbf16>, vector<16x128xf32> -> vector<16x128xf32>
    %205 = arith.addf %180, %204 : vector<16x128xf32>
    %c0_55 = arith.constant 0 : index
    %c0_56 = arith.constant 0 : index
    %206 = vector.load %arg4[%c0_55, %c0_56] : memref<1x128xf32, #tpu.memory_space<vmem>>, vector<1x128xf32>
    %207 = vector.broadcast %206 : vector<1x128xf32> to vector<16x128xf32>
    %208 = arith.addf %205, %207 : vector<16x128xf32>
    %c0_57 = arith.constant 0 : index
    %c0_58 = arith.constant 0 : index
    %c0_59 = arith.constant 0 : index
    %209 = vector.load %arg5[%c0_57, %c0_58, %c0_59] : memref<1x16x128xf32, #tpu.memory_space<vmem>>, vector<1x16x128xf32>
    %210 = vector.shape_cast %209 : vector<1x16x128xf32> to vector<16x128xf32>
    %211 = vector.shape_cast %208 : vector<16x128xf32> to vector<1x16x128xf32>
    tpu.vector_store %arg5[%c0_57, %c0_58, %c0_59], %211 {strides = array<i32>} : memref<1x16x128xf32, #tpu.memory_space<vmem>>, vector<1x16x128xf32>,
    return
  }
  func.func @transform_0(%arg0: i32) -> (i32, i32, i32) {
    %c0_i32 = arith.constant 0 : i32
    %c0_i32_0 = arith.constant 0 : i32
    %c0_i32_1 = arith.constant 0 : i32
    return %arg0, %c0_i32, %c0_i32_0 : i32, i32, i32
  }
  func.func @transform_1(%arg0: i32) -> (i32, i32) {
    %c0_i32 = arith.constant 0 : i32
    %c0_i32_0 = arith.constant 0 : i32
    %c0_i32_1 = arith.constant 0 : i32
    return %c0_i32, %c0_i32_0 : i32, i32
  }
  func.func @transform_2(%arg0: i32) -> (i32, i32) {
    %c0_i32 = arith.constant 0 : i32
    %c0_i32_0 = arith.constant 0 : i32
    %c0_i32_1 = arith.constant 0 : i32
    return %c0_i32, %c0_i32_0 : i32, i32
  }
  func.func @transform_3(%arg0: i32) -> (i32, i32) {
    %c0_i32 = arith.constant 0 : i32
    %c0_i32_0 = arith.constant 0 : i32
    %c0_i32_1 = arith.constant 0 : i32
    return %c0_i32, %c0_i32_0 : i32, i32
  }
  func.func @transform_4(%arg0: i32) -> (i32, i32, i32) {
    %c0_i32 = arith.constant 0 : i32
    %c0_i32_0 = arith.constant 0 : i32
    %c0_i32_1 = arith.constant 0 : i32
    return %arg0, %c0_i32, %c0_i32_0 : i32, i32, i32
  }
}

</mosaic_0001>

<bundles_post_ra>
// kernel: sdp_attention.1
= control target key start
LH: loop header
LB: loop body
LE: loop exit
PB: predicated region body
PF: predicated region fallthrough
CT: control target
= control target key end

     0   :  { %9 = vsyncpa [#allocation3], 0  ;;  %s2058_s0 = inlined_call_operand.vmem [shape: bf16[2,16,128], index: 0, kind: input, shape index: {}]   ;;  %s2059_s1 = inlined_call_operand.vmem [shape: bf16[128,384], index: 1, kind: input, shape index: {}]   ;;  %s2060_s2 = inlined_call_operand.vmem [shape: bf16[128,128], index: 2, kind: input, shape index: {}]   ;;  %s2061_s3 = inlined_call_operand.vmem [shape: f32[1,128], index: 3, kind: input, shape index: {}]   ;;  %s2062_s4 = inlined_call_operand.hbm [shape: f32[2,16,128], index: 4, kind: output, shape index: {}]  }
   0x1   :  { %11 = vsyncpa [#allocation3 + $0x1], 0  ;;  %s1665_s15 = smov 0   ;;  %s1667_s16 = smov 0  }
   0x2   :  { %s1669_s17 = smov 0   ;;  %s1671_s18 = smov 0  }
   0x3 LB: > { %s1686_s19 = sadd.s32 4294967295, %s1629_s18   ;;  %s1251_s20 = sadd.s32 4294967294, %s1629_s18   ;;  %s1629_s18 = sphi %s1671_s18, %s2068_s18   ;;  %s1625_s17 = sphi %s1669_s17, %s2067_s17   ;;  %s1621_s16 = sphi %s1667_s16, %s2066_s16   ;;  %s1617_s15 = sphi %s1665_s15, %s2065_s15  }
   0x4   : > { %s1690_s21 = sadd.s32 1, %s1629_s18   ;;  %s113_s22 = sadd.s32 1, %s1625_s17 }
   0x5   : > { %s110_s23 = ssub.s32 %s1629_s18, %s1690_s21  ;;  %p123_p0 = scmp.ne.s32.totalorder %s1625_s17, %s1621_s16 }
   0x6   : > { %p111_p1 = scmp.eq.s32.totalorder %s110_s23, 0  ;;  %p124_p2 = scmp.eq.s32.totalorder %s1686_s19, 1 }
   0x7   : > { %p129_p3 = scmp.ne.s32.totalorder %s1621_s16, %s1617_s15  ;;  %p130_p4 = scmp.eq.s32.totalorder %s1251_s20, 1 }
   0x8   : > { %s1701_s24 = scalar_select %p111_p1, %s1625_s17, %s113_s22  }
   0x9   : > { %p1703_p5 = por %p124_p2, %p123_p0  ;;  %p1707_p6 = por %p130_p4, %p129_p3 }
   0xa   : > { %p1254_p7 = scmp.ge.s32.totalorder %s1629_s18, 1  ;;  %p165_p8 = scmp.lt.s32.totalorder %s1629_s18, 3 }
   0xc   : > { %p166_p9 = pnand %p1254_p7, %p165_p8 }
   0xd   : > { %p191_p10 = scmp.lt.s32.totalorder (!%p166_p9), %s1686_s19, 1  ;;  %s1631_s23 = smov (!%p166_p9), 112  }
   0xe   : > { %169 = sbr.rel (%p166_p9) target bundleno = 2563 (0xa03), region = 36  ;;  %s1632_s28 = smov (!%p166_p9), 80  }
   0xf   : > { %s1633_s29 = smov (!%p166_p9), 96   ;;  %s1634_s6 = smov (!%p166_p9), 64  }
  0x10   : > { %s1635_s7 = smov (!%p166_p9), 48   ;;  %s1636_s13 = smov (!%p166_p9), 16  }
  0x11   : > { %s1453_s10 = sshll.u32 (!%p166_p9), %s1686_s19, 4 }
  0x13   : > { %v1348_v0 = vld [vmem:[%s2059_s1 + $0xa8] sm:$0xf]  ;;  %v1443_v1 = vld [vmem:[%s2059_s1 + $0xb0] sm:$0xf0]  ;;  %v1442_v2 = vld [vmem:[%s2059_s1 + $0xac] sm:$0xf] }
  0x14   : > { %v1349_v3 = vor.u32 %v1443_v1, %v1348_v0  ;;  %v1350_v4 = vld [vmem:[%s2059_s1 + $0xb4] sm:$0xf0]  ;;  %v1336_v5 = vld [vmem:[%s2059_s1 + $0x90] sm:$0xf]  ;;  %v1440_v6 = vld [vmem:[%s2059_s1 + $0x98] sm:$0xf0] }
  0x15   : > { %v1353_v7 = vor.u32 %v1442_v2, %v1350_v4  ;;  %v1439_v8 = vld [vmem:[%s2059_s1 + $0x94] sm:$0xf]  ;;  %v1338_v9 = vld [vmem:[%s2059_s1 + $0x9c] sm:$0xf0]  ;;  %v1337_v10 = vor.u32 %v1440_v6, %v1336_v5  ;;  %v1324_v12 = vld [vmem:[%s2059_s1 + $0x78] sm:$0xf] }
  0x16   : > { %365 = vmatpush.bf16.msra.mxu0 %v1349_v3  ;;  %v1341_v11 = vor.u32 %v1439_v8, %v1338_v9  ;;  %v1437_v13 = vld [vmem:[%s2059_s1 + $0x80] sm:$0xf0]  ;;  %v1436_v14 = vld [vmem:[%s2059_s1 + $0x7c] sm:$0xf]  ;;  %v1326_v15 = vld [vmem:[%s2059_s1 + $0x84] sm:$0xf0] }
  0x17   : > { %379 = vmatpush.bf16.msra.mxu1 %v1353_v7  ;;  %v1325_v16 = vor.u32 %v1437_v13, %v1324_v12  ;;  %v1329_v17 = vor.u32 %v1436_v14, %v1326_v15  ;;  %v1312_v18 = vld [vmem:[%s2059_s1 + $0x60] sm:$0xf]  ;;  %v1434_v19 = vld [vmem:[%s2059_s1 + $0x68] sm:$0xf0]  ;;  %v1433_v20 = vld [vmem:[%s2059_s1 + $0x64] sm:$0xf] }
  0x18   : > { %v1314_v21 = vld [vmem:[%s2059_s1 + $0x6c] sm:$0xf0]  ;;  %v1313_v22 = vor.u32 %v1434_v19, %v1312_v18  ;;  %v1444_v24 = vld [vmem:[%s2059_s1 + $0xb8] sm:$0xf0]  ;;  %v1344_v25 = vld [vmem:[%s2059_s1 + $0x98] sm:$0xf] }
  0x19   : > { %v1356_v23 = vld [vmem:[%s2059_s1 + $0xb0] sm:$0xf]  ;;  %v1317_v26 = vor.u32 %v1433_v20, %v1314_v21  ;;  %v1300_v27 = vld [vmem:[%s2059_s1 + $0x48] sm:$0xf]  ;;  %v1431_v28 = vld [vmem:[%s2059_s1 + $0x50] sm:$0xf0] }
  0x1a   : > { %366 = vmatpush.bf16.msra.mxu0 %v1337_v10  ;;  %v1357_v29 = vor.u32 %v1444_v24, %v1356_v23  ;;  %v1441_v30 = vld [vmem:[%s2059_s1 + $0xa0] sm:$0xf0]  ;;  %v1430_v31 = vld [vmem:[%s2059_s1 + $0x4c] sm:$0xf]  ;;  %v1302_v32 = vld [vmem:[%s2059_s1 + $0x54] sm:$0xf0]  ;;  %v1301_v34 = vor.u32 %v1431_v28, %v1300_v27 }
  0x1b   : > { %380 = vmatpush.bf16.msra.mxu1 %v1341_v11  ;;  %v1345_v33 = vor.u32 %v1441_v30, %v1344_v25  ;;  %v1332_v35 = vld [vmem:[%s2059_s1 + $0x80] sm:$0xf]  ;;  %v1438_v36 = vld [vmem:[%s2059_s1 + $0x88] sm:$0xf0]  ;;  %v1305_v37 = vor.u32 %v1430_v31, %v1302_v32  ;;  %v1288_v38 = vld [vmem:[%s2059_s1 + $0x30] sm:$0xf] }
  0x1c   : > { %393 = vmatpush.bf16.msra.mxu2 %v1357_v29  ;;  %v1428_v39 = vld [vmem:[%s2059_s1 + $0x38] sm:$0xf0]  ;;  %v1427_v40 = vld [vmem:[%s2059_s1 + $0x34] sm:$0xf]  ;;  %v1290_v41 = vld [vmem:[%s2059_s1 + $0x3c] sm:$0xf0]  ;;  %v1333_v42 = vor.u32 %v1438_v36, %v1332_v35 }
  0x1d   : > { %v1289_v43 = vor.u32 %v1428_v39, %v1288_v38  ;;  %v1320_v44 = vld [vmem:[%s2059_s1 + $0x68] sm:$0xf]  ;;  %v1435_v45 = vld [vmem:[%s2059_s1 + $0x70] sm:$0xf0]  ;;  %v1293_v46 = vor.u32 %v1427_v40, %v1290_v41  ;;  %v1276_v47 = vld [vmem:[%s2059_s1 + $0x18] sm:$0xf] }
  0x1e   : > { %367 = vmatpush.bf16.msra.mxu0 %v1325_v16  ;;  %v1425_v48 = vld [vmem:[%s2059_s1 + $0x20] sm:$0xf0]  ;;  %s192_s27 = scalar_select %p191_p10, %s1686_s19, 1  ;;  %v1424_v49 = vld [vmem:[%s2059_s1 + $0x1c] sm:$0xf]  ;;  %v1321_v51 = vor.u32 %v1435_v45, %v1320_v44  ;;  %vm428_vm0 = vcmask 130048  }
  0x1f   : > { %381 = vmatpush.bf16.msra.mxu1 %v1329_v17  ;;  %v1278_v50 = vld [vmem:[%s2059_s1 + $0x24] sm:$0xf0]  ;;  %v1277_v52 = vor.u32 %v1425_v48, %v1276_v47  ;;  %v1308_v53 = vld [vmem:[%s2059_s1 + $0x50] sm:$0xf]  ;;  %v1432_v54 = vld [vmem:[%s2059_s1 + $0x58] sm:$0xf0] }
  0x20   : > { %394 = vmatpush.bf16.msra.mxu2 %v1345_v33  ;;  %v1281_v55 = vor.u32 %v1424_v49, %v1278_v50  ;;  %v1264_v56 = vld [vmem:[%s2059_s1] sm:$0xf]  ;;  %v1422_v57 = vld [vmem:[%s2059_s1 + $0x8] sm:$0xf0]  ;;  %s1419_s14 = sshll.u32 %s192_s27, 3  ;;  %v1309_v60 = vor.u32 %v1432_v54, %v1308_v53 }
  0x21   : > { %v1421_v58 = vld [vmem:[%s2059_s1 + $0x4] sm:$0xf]  ;;  %v1266_v59 = vld [vmem:[%s2059_s1 + $0xc] sm:$0xf0]  ;;  %v1265_v61 = vor.u32 %v1422_v57, %v1264_v56  ;;  %s195_s5 = scalar_lea.vmem %s2058_s0, %s1419_s14  ;;  %v1296_v62 = vld [vmem:[%s2059_s1 + $0x38] sm:$0xf] }
  0x22   : > { %368 = vmatpush.bf16.msra.mxu0 %v1313_v22  ;;  %v1429_v63 = vld [vmem:[%s2059_s1 + $0x40] sm:$0xf0]  ;;  %v1269_v0 = vor.u32 %v1421_v58, %v1266_v59  ;;  %v1284_v3 = vld [vmem:[%s2059_s1 + $0x20] sm:$0xf]  ;;  %v1426_v4 = vld [vmem:[%s2059_s1 + $0x28] sm:$0xf0] }
  0x23   : > { %382 = vmatpush.bf16.msra.mxu1 %v1317_v26  ;;  %v1420_v1 = vld [vmem:[%s195_s5] sm:$0xff]  ;;  %v1297_v2 = vor.u32 %v1429_v63, %v1296_v62  ;;  %v1285_v5 = vor.u32 %v1426_v4, %v1284_v3  ;;  %v1272_v6 = vld [vmem:[%s2059_s1 + $0x8] sm:$0xf]  ;;  %v1423_v7 = vld [vmem:[%s2059_s1 + $0x10] sm:$0xf0]  ;;  %s1637_s14 = smov 32  }
  0x24   : > { %395 = vmatpush.bf16.msra.mxu2 %v1333_v42  ;;  %v1273_v8 = vor.u32 %v1423_v7, %v1272_v6  ;;  %v1445_v27 = vld [vmem:[%s2060_s2] sm:$0xff]  ;;  %s1587_s5 = scalar_lea.hbm %s2062_s4, 32 }
  0x26   : > { %369 = vmatpush.bf16.msra.mxu0 %v1301_v34 }
  0x27   : > { %383 = vmatpush.bf16.msra.mxu1 %v1305_v37 }
  0x28   : > { %396 = vmatpush.bf16.msra.mxu2 %v1321_v51 }
  0x2a   : > { %370 = vmatpush.bf16.msra.mxu0 %v1289_v43 }
  0x2b   : > { %384 = vmatpush.bf16.msra.mxu1 %v1293_v46 }
  0x2c   : > { %397 = vmatpush.bf16.msra.mxu2 %v1309_v60 }
  0x2e   : > { %371 = vmatpush.bf16.msra.mxu0 %v1277_v52 }
  0x2f   : > { %385 = vmatpush.bf16.msra.mxu1 %v1281_v55 }
  0x30   : > { %398 = vmatpush.bf16.msra.mxu2 %v1297_v2 }
  0x32   : > { %372 = vmatpush.bf16.msra.mxu0 %v1265_v61 }
  0x33   : > { %386 = vmatpush.bf16.msra.mxu1 %v1269_v0 }
  0x34   : > { %399 = vmatpush.bf16.msra.mxu2 %v1285_v5 }
  0x35   : > { %373 = vmatmul.bf16.vlgmr.msra.gmra.mxu0 %v1420_v1 }
  0x36   : > { %387 = vmatmul.bf16.vlgmr.msra.gmra.mxu1 %v1420_v1 }
  0x38   : > { %400 = vmatpush.bf16.msra.mxu2 %v1273_v8 }
  0x3b   : > { %401 = vmatmul.bf16.vlgmr.msra.gmra.mxu2 %v1420_v1 }
  0x3c   : > { %600 = vmatpush.bf16.msrb.mxu2 %v1445_v27 }
  0xb2   : > { %v374_v9 = vpop.f32.mrf.mxu0 }
  0xb3   : > { %v388_v10 = vpop.f32.mrf.mxu1  ;;  %v423_v16 = vmul.f32 0.25, %v374_v9 }
  0xba   : > { %v376_v13 = vpop.f32.mrf.mxu0 }
  0xbb   : > { %v390_v11 = vpop.f32.mrf.mxu1  ;;  %v424_v15 = vmul.f32 0.25, %v376_v13 }
  0xbc   : > { %v1862_v12 = vpack.c.bf16 %v390_v11, %v388_v10 }
  0xbd   : > { %v1868_v18 = vpack.c.bf16 %v424_v15, %v423_v16 }
  0xbe   : > { %494 = vrot.lane.b32.xlu2 %v1862_v12, %s1631_s23  ;;  %v433_v14 = vsel %vm428_vm0, %v1862_v12, 0  ;;  %v402_v17 = vpop.f32.mrf.mxu2 }
  0xbf   : > { %442 = vmatpush.bf16.xpose.msra.mxu3 %v433_v14 }
  0xc6   : > { %491 = vrot.lane.b32.xlu2 %v1868_v18, %s1631_s23  ;;  %1358 = vmatmul.msk.bf16.vlgmr.msra.gmra.mxu3 %vm428_vm0, %v1868_v18  ;;  %v404_v19 = vpop.f32.mrf.mxu2 }
  0xc7   : > { %v1874_v20 = vpack.c.bf16 %v404_v19, %v402_v17 }
  0xc9   : > { %482 = vmatpush.bf16.msrb.mxu3 %v1874_v20 }
  0xce   : > { %700 = vrot.lane.b32.xlu2 %v1868_v18, %s1632_s28 }
  0xd6   : > { %607 = vrot.lane.b32.xlu2 %v1868_v18, %s1633_s29 }
 0x118   : > { %v495_v21 = vpop.permute.xlu2 %494 }
 0x119   : > { %v500_v22 = vsel %vm428_vm0, %v495_v21, 0 }
 0x11a   : > { %509 = vmatpush.bf16.xpose.msra.mxu3 %v500_v22 }
 0x120   : > { %v492_v47 = vpop.permute.xlu2 %491 }
 0x128   : > { %v701_v50 = vpop.permute.xlu2 %700 }
 0x130   : > { %v608_v51 = vpop.permute.xlu2 %607 }
 0x149   : > { %v444_v23 = vpop.f32.mrf.mxu3 }
 0x14a   : > { %v449_v24 = vsel %vm428_vm0, %v444_v23, -inf }
 0x14b   : > { %450 = vmax.xlane.f32.xlu0 %v449_v24 }
 0x151   : > { %v446_v25 = vpop.f32.mrf.mxu3 }
 0x152   : > { %v452_v26 = vsel %vm428_vm0, %v446_v25, -inf }
 0x153   : > { %453 = vmax.xlane.f32.xlu0 %v452_v26 }
 0x167   : > { %702 = vrot.lane.b32.xlu0 %v1862_v12, %s1632_s28 }
 0x1be   : > { %v451_v28 = vpop.xlane.xlu0 %450 }
 0x1bf   : > { %v455_v29 = vsub.f32 %v444_v23, %v451_v28 }
 0x1c1   : > { %v457_v30 = vmul.f32 1.442695, %v455_v29 }
 0x1c3   : > { %1503 = vpow2.f32 %v457_v30 }
 0x1c6   : > { %v454_v31 = vpop.xlane.xlu0 %453 }
 0x1c7   : > { %v456_v32 = vsub.f32 %v446_v25, %v454_v31 }
 0x1c9   : > { %v1504_v33 = vpop.eup %1503  ;;  %v459_v34 = vmul.f32 1.442695, %v456_v32 }
 0x1ca   : > { %v461_v35 = vsel %vm428_vm0, %v1504_v33, 0.0 }
 0x1cb   : > { %1505 = vpow2.f32 %v459_v34  ;;  %462 = vadd.xlane.f32.xlu1 %v461_v35 }
 0x1d1   : > { %v1506_v36 = vpop.eup %1505 }
 0x1d2   : > { %v464_v37 = vsel %vm428_vm0, %v1506_v36, 0.0 }
 0x1d3   : > { %465 = vadd.xlane.f32.xlu1 %v464_v37 }
 0x1d9   : > { %v703_v38 = vpop.permute.xlu0 %702 }
 0x1da   : > { %v708_v39 = vsel %vm428_vm0, %v703_v38, 0 }
 0x1db   : > { %717 = vmatpush.bf16.xpose.msra.mxu2 %v708_v39 }
 0x1ec   : > { %609 = vrot.lane.b32.xlu1 %v1862_v12, %s1633_s29 }
 0x23e   : > { %v463_v40 = vpop.xlane.xlu1 %462 }
 0x23f   : > { %1507 = vrcp.f32 %v463_v40 }
 0x245   : > { %v1508_v42 = vpop.eup %1507 }
 0x246   : > { %v466_v41 = vpop.xlane.xlu1 %465  ;;  %v469_v44 = vmul.f32 %v1508_v42, %v1504_v33 }
 0x247   : > { %1509 = vrcp.f32 %v466_v41 }
 0x24d   : > { %v1510_v43 = vpop.eup %1509 }
 0x24e   : > { %v470_v45 = vmul.f32 %v1510_v43, %v1506_v36 }
 0x250   : > { %v471_v46 = vpack.c.bf16 %v470_v45, %v469_v44 }
 0x252   : > { %1359 = vmatmul.msk.bf16.vlgmr.msrb.gmra.mxu3 %vm428_vm0, %v471_v46  ;;  %v1446_v46 = vld [vmem:[%s2060_s2 + $0x8] sm:$0xff] }
 0x253   : > { %577 = vmatpush.bf16.msrb.mxu1 %v1446_v46 }
 0x25e   : > { %v610_v48 = vpop.permute.xlu1 %609 }
 0x25f   : > { %v615_v49 = vsel %vm428_vm0, %v610_v48, 0 }
 0x260   : > { %624 = vmatpush.bf16.xpose.msrb.mxu3 %v615_v49 }
 0x262   : > { %1360 = vmatmul.msk.bf16.vlgmr.msra.gmra.mxu3 %vm428_vm0, %v492_v47  ;;  %v1447_v47 = vld [vmem:[%s2060_s2 + $0x10] sm:$0xff] }
 0x263   : > { %691 = vmatpush.bf16.msra.mxu1 %v1447_v47 }
 0x272   : > { %1372 = vmatmul.msk.bf16.vlgmr.msrb.gmra.mxu3 %vm428_vm0, %v608_v51 }
 0x2d5   : > { %v484_v52 = vpop.f32.mrf.mxu3 }
 0x2dd   : > { %v486_v53 = vpop.f32.mrf.mxu3 }
 0x2de   : > { %v489_v54 = vpack.c.bf16 %v486_v53, %v484_v52 }
 0x2e0   : > { %1371 = vmatmul.msk.bf16.vlgmr.msrb.gmra.mxu2 %vm428_vm0, %v489_v54 }
 0x2e5   : > { %v511_v55 = vpop.f32.mrf.mxu3 }
 0x2e6   : > { %v516_v56 = vsel %vm428_vm0, %v511_v55, -inf }
 0x2e7   : > { %517 = vmax.xlane.f32.xlu2 %v516_v56 }
 0x2ed   : > { %v513_v57 = vpop.f32.mrf.mxu3 }
 0x2ee   : > { %v519_v58 = vsel %vm428_vm0, %v513_v57, -inf }
 0x2ef   : > { %520 = vmax.xlane.f32.xlu0 %v519_v58 }
 0x2f0   : > { %1379 = vmatmul.msk.bf16.vlgmr.msra.gmra.mxu2 %vm428_vm0, %v701_v50 }
 0x2f5   : > { %v626_v59 = vpop.f32.mrf.mxu3 }
 0x2f6   : > { %v631_v60 = vsel %vm428_vm0, %v626_v59, -inf }
 0x2f7   : > { %632 = vmax.xlane.f32.xlu0 %v631_v60 }
 0x2fd   : > { %v628_v19 = vpop.f32.mrf.mxu3 }
 0x2fe   : > { %v634_v21 = vsel %vm428_vm0, %v628_v19, -inf }
 0x35a   : > { %v518_v1 = vpop.xlane.xlu2 %517 }
 0x35b   : > { %v522_v2 = vsub.f32 %v511_v55, %v518_v1 }
 0x35d   : > { %v524_v6 = vmul.f32 1.442695, %v522_v2 }
 0x362   : > { %v521_v61 = vpop.xlane.xlu0 %520 }
 0x363   : > { %v523_v62 = vsub.f32 %v513_v57, %v521_v61  ;;  %v1903_v63 = vpop.f32.mrf.mxu2 }
 0x365   : > { %v526_v0 = vmul.f32 1.442695, %v523_v62 }
 0x367   : > { %1511 = vpow2.f32 %v526_v0 }
 0x368   : > { %1513 = vpow2.f32 %v524_v6 }
 0x36a   : > { %v633_v7 = vpop.xlane.xlu0 %632 }
 0x36b   : > { %v1905_v3 = vpop.f32.mrf.mxu2  ;;  %v637_v8 = vsub.f32 %v626_v59, %v633_v7 }
 0x36d   : > { %v1512_v4 = vpop.eup %1511  ;;  %v639_v11 = vmul.f32 1.442695, %v637_v8 }
 0x36e   : > { %v531_v5 = vsel %vm428_vm0, %v1512_v4, 0.0  ;;  %v1514_v13 = vpop.eup %1513 }
 0x36f   : > { %532 = vadd.xlane.f32.xlu0 %v531_v5  ;;  %1515 = vpow2.f32 %v639_v11  ;;  %v528_v15 = vsel %vm428_vm0, %v1514_v13, 0.0 }
 0x373   : > { %v719_v9 = vpop.f32.mrf.mxu2 }
 0x374   : > { %v724_v10 = vsel %vm428_vm0, %v719_v9, -inf }
 0x375   : > { %725 = vmax.xlane.f32.xlu1 %v724_v10  ;;  %v1911_v17 = vpop.eup %1515 }
 0x376   : > { %v643_v22 = vsel %vm428_vm0, %v1911_v17, 0.0 }
 0x37b   : > { %v721_v14 = vpop.f32.mrf.mxu2 }
 0x37c   : > { %v727_v16 = vsel %vm428_vm0, %v721_v14, -inf }
 0x37d   : > { %529 = vadd.xlane.f32.xlu1 %v528_v15  ;;  %728 = vmax.xlane.f32.xlu2 %v727_v16 }
 0x385   : > { %635 = vmax.xlane.f32.xlu2 %v634_v21  ;;  %644 = vadd.xlane.f32.xlu1 %v643_v22 }
 0x39d   : > { %540 = vrot.lane.b32.xlu2 %v1874_v20, %s1631_s23 }
 0x3a5   : > { %795 = vrot.lane.b32.xlu2 %v1862_v12, %s1634_s6 }
 0x3ad   : > { %888 = vrot.lane.b32.xlu2 %v1862_v12, %s1635_s7 }
 0x3b5   : > { %793 = vrot.lane.b32.xlu2 %v1868_v18, %s1634_s6 }
 0x3e2   : > { %v533_v29 = vpop.xlane.xlu0 %532 }
 0x3e8   : > { %v726_v23 = vpop.xlane.xlu1 %725 }
 0x3e9   : > { %v730_v24 = vsub.f32 %v719_v9, %v726_v23 }
 0x3eb   : > { %v732_v25 = vmul.f32 1.442695, %v730_v24 }
 0x3ed   : > { %1517 = vpow2.f32 %v732_v25 }
 0x3f0   : > { %v729_v26 = vpop.xlane.xlu2 %728  ;;  %v530_v27 = vpop.xlane.xlu1 %529 }
 0x3f1   : > { %1519 = vrcp.f32 %v530_v27  ;;  %v731_v34 = vsub.f32 %v721_v14, %v729_v26 }
 0x3f2   : > { %1521 = vrcp.f32 %v533_v29 }
 0x3f3   : > { %v1518_v28 = vpop.eup %1517  ;;  %v734_v38 = vmul.f32 1.442695, %v731_v34 }
 0x3f4   : > { %v736_v30 = vsel %vm428_vm0, %v1518_v28, 0.0 }
 0x3f5   : > { %737 = vadd.xlane.f32.xlu1 %v736_v30 }
 0x3f7   : > { %v1520_v33 = vpop.eup %1519 }
 0x3f8   : > { %v636_v31 = vpop.xlane.xlu2 %635  ;;  %v1522_v36 = vpop.eup %1521  ;;  %v536_v37 = vmul.f32 %v1520_v33, %v1514_v13 }
 0x3f9   : > { %v638_v32 = vsub.f32 %v628_v19, %v636_v31  ;;  %v537_v39 = vmul.f32 %v1522_v36, %v1512_v4  ;;  %v645_v48 = vpop.xlane.xlu1 %644  ;;  %v1448_v4 = vld [vmem:[%s2060_s2 + $0x18] sm:$0xff] }
 0x3fb   : > { %v641_v35 = vmul.f32 1.442695, %v638_v32  ;;  %v538_v41 = vpack.c.bf16 %v537_v39, %v536_v37 }
 0x3fd   : > { %1523 = vpow2.f32 %v641_v35 }
 0x3fe   : > { %1525 = vpow2.f32 %v734_v38 }
 0x400   : > { %v541_v40 = vpop.permute.xlu2 %540 }
 0x401   : > { %553 = vmatpush.bf16.msrb.mxu0 %v541_v40 }
 0x403   : > { %v1524_v42 = vpop.eup %1523 }
 0x404   : > { %1361 = vmatmul.msk.bf16.vlgmr.msrb.gmra.mxu0 %vm428_vm0, %v538_v41  ;;  %v646_v43 = vsel %vm428_vm0, %v1524_v42, 0.0  ;;  %v1526_v44 = vpop.eup %1525 }
 0x405   : > { %647 = vadd.xlane.f32.xlu0 %v646_v43  ;;  %v739_v45 = vsel %vm428_vm0, %v1526_v44, 0.0 }
 0x408   : > { %v796_v58 = vpop.permute.xlu2 %795 }
 0x409   : > { %v801_v62 = vsel %vm428_vm0, %v796_v58, 0 }
 0x40d   : > { %740 = vadd.xlane.f32.xlu0 %v739_v45 }
 0x40e   : > { %747 = vrot.lane.b32.xlu1 %v1874_v20, %s1632_s28 }
 0x410   : > { %v889_v7 = vpop.permute.xlu2 %888 }
 0x411   : > { %v894_v9 = vsel %vm428_vm0, %v889_v7, 0 }
 0x418   : > { %v794_v19 = vpop.permute.xlu2 %793 }
 0x421   : > { %654 = vrot.lane.b32.xlu0 %v1874_v20, %s1633_s29 }
 0x429   : > { %886 = vrot.lane.b32.xlu0 %v1868_v18, %s1635_s7 }
 0x468   : > { %v738_v49 = vpop.xlane.xlu1 %737 }
 0x469   : > { %1527 = vrcp.f32 %v738_v49 }
 0x46f   : > { %v1528_v54 = vpop.eup %1527 }
 0x470   : > { %v744_v56 = vmul.f32 %v1528_v54, %v1518_v28 }
 0x478   : > { %v648_v50 = vpop.xlane.xlu0 %647 }
 0x480   : > { %v748_v51 = vpop.permute.xlu1 %747  ;;  %v741_v52 = vpop.xlane.xlu0 %740 }
 0x481   : > { %1529 = vrcp.f32 %v741_v52  ;;  %v555_v53 = vpop.f32.mrf.mxu0  ;;  %760 = vmatpush.bf16.msra.mxu3 %v748_v51 }
 0x482   : > { %1531 = vrcp.f32 %v648_v50 }
 0x483   : > { %1533 = vrcp.f32 %v645_v48 }
 0x487   : > { %v1530_v55 = vpop.eup %1529 }
 0x488   : > { %v745_v57 = vmul.f32 %v1530_v55, %v1526_v44  ;;  %v1532_v0 = vpop.eup %1531 }
 0x489   : > { %v557_v59 = vpop.f32.mrf.mxu0  ;;  %v1534_v1 = vpop.eup %1533  ;;  %v652_v2 = vmul.f32 %v1532_v0, %v1524_v42 }
 0x48a   : > { %v746_v60 = vpack.c.bf16 %v745_v57, %v744_v56  ;;  %v560_v61 = vpack.c.bf16 %v557_v59, %v555_v53  ;;  %v651_v5 = vmul.f32 %v1534_v1, %v1911_v17 }
 0x48c   : > { %1366 = vmatmul.msk.bf16.vlgmr.msrb.gmra.mxu1 %vm428_vm0, %v560_v61  ;;  %1380 = vmatmul.msk.bf16.vlgmr.msra.gmra.mxu3 %vm428_vm0, %v746_v60  ;;  %v653_v8 = vpack.c.bf16 %v652_v2, %v651_v5  ;;  %v1449_v60 = vld [vmem:[%s2060_s2 + $0x20] sm:$0xff] }
 0x48d   : > { %810 = vmatpush.bf16.xpose.msrb.mxu1 %v801_v62  ;;  %877 = vmatpush.bf16.msrb.mxu3 %v1449_v60 }
 0x493   : > { %v655_v6 = vpop.permute.xlu0 %654 }
 0x494   : > { %667 = vmatpush.bf16.msra.mxu0 %v655_v6 }
 0x497   : > { %1373 = vmatmul.msk.bf16.vlgmr.msra.gmra.mxu0 %vm428_vm0, %v653_v8 }
 0x498   : > { %784 = vmatpush.bf16.msrb.mxu0 %v1448_v4 }
 0x49b   : > { %v887_v17 = vpop.permute.xlu0 %886 }
 0x49c   : > { %903 = vmatpush.bf16.xpose.msra.mxu0 %v894_v9  ;;  %v1450_v9 = vld [vmem:[%s2060_s2 + $0x28] sm:$0xff] }
 0x509   : > { %v579_v21 = vpop.f32.mrf.mxu1 }
 0x50a   : > { %v603_v24 = vadd.f32 %v1903_v63, %v579_v21 }
 0x50f   : > { %v762_v10 = vpop.f32.mrf.mxu3 }
 0x511   : > { %v581_v22 = vpop.f32.mrf.mxu1 }
 0x512   : > { %v605_v29 = vadd.f32 %v1905_v3, %v581_v22 }
 0x514   : > { %v669_v11 = vpop.f32.mrf.mxu0 }
 0x517   : > { %v764_v13 = vpop.f32.mrf.mxu3 }
 0x518   : > { %v767_v14 = vpack.c.bf16 %v764_v13, %v762_v10 }
 0x51a   : > { %1385 = vmatmul.msk.bf16.vlgmr.msrb.gmra.mxu0 %vm428_vm0, %v767_v14 }
 0x51c   : > { %v671_v15 = vpop.f32.mrf.mxu0 }
 0x51d   : > { %v674_v16 = vpack.c.bf16 %v671_v15, %v669_v11 }
 0x51f   : > { %1378 = vmatmul.msk.bf16.vlgmr.msra.gmra.mxu1 %vm428_vm0, %v674_v16 }
 0x52a   : > { %1393 = vmatmul.msk.bf16.vlgmr.msra.gmra.mxu0 %vm428_vm0, %v887_v17 }
 0x52f   : > { %1386 = vmatmul.msk.bf16.vlgmr.msrb.gmra.mxu1 %vm428_vm0, %v794_v19 }
 0x597   : > { %v786_v23 = vpop.f32.mrf.mxu0 }
 0x59c   : > { %v693_v25 = vpop.f32.mrf.mxu1 }
 0x59d   : > { %v698_v26 = vadd.f32 %v693_v25, %v603_v24 }
 0x59f   : > { %v788_v27 = vpop.f32.mrf.mxu0  ;;  %v1954_v28 = vadd.f32 %v786_v23, %v698_v26 }
 0x5a4   : > { %v695_v30 = vpop.f32.mrf.mxu1 }
 0x5a5   : > { %v699_v31 = vadd.f32 %v695_v30, %v605_v29 }
 0x5a7   : > { %v905_v32 = vpop.f32.mrf.mxu0  ;;  %v1957_v33 = vadd.f32 %v788_v27, %v699_v31 }
 0x5a8   : > { %v910_v34 = vsel %vm428_vm0, %v905_v32, -inf }
 0x5a9   : > { %911 = vmax.xlane.f32.xlu0 %v910_v34 }
 0x5ac   : > { %v812_v35 = vpop.f32.mrf.mxu1 }
 0x5ad   : > { %v817_v36 = vsel %vm428_vm0, %v812_v35, -inf }
 0x5ae   : > { %818 = vmax.xlane.f32.xlu1 %v817_v36 }
 0x5af   : > { %v907_v63 = vpop.f32.mrf.mxu0 }
 0x5b0   : > { %v913_v39 = vsel %vm428_vm0, %v907_v63, -inf }
 0x5b4   : > { %v814_v37 = vpop.f32.mrf.mxu1 }
 0x5b5   : > { %v820_v38 = vsel %vm428_vm0, %v814_v37, -inf }
 0x5b6   : > { %821 = vmax.xlane.f32.xlu2 %v820_v38  ;;  %914 = vmax.xlane.f32.xlu1 %v913_v39 }
 0x61c   : > { %v912_v3 = vpop.xlane.xlu0 %911 }
 0x61d   : > { %v916_v40 = vsub.f32 %v905_v32, %v912_v3 }
 0x61f   : > { %v918_v41 = vmul.f32 1.442695, %v916_v40 }
 0x621   : > { %1535 = vpow2.f32 %v918_v41  ;;  %v819_v42 = vpop.xlane.xlu1 %818 }
 0x622   : > { %v823_v43 = vsub.f32 %v812_v35, %v819_v42 }
 0x624   : > { %v825_v44 = vmul.f32 1.442695, %v823_v43 }
 0x626   : > { %1537 = vpow2.f32 %v825_v44 }
 0x627   : > { %v1536_v45 = vpop.eup %1535 }
 0x628   : > { %v922_v46 = vsel %vm428_vm0, %v1536_v45, 0.0 }
 0x629   : > { %v822_v47 = vpop.xlane.xlu2 %821  ;;  %923 = vadd.xlane.f32.xlu1 %v922_v46  ;;  %v915_v48 = vpop.xlane.xlu1 %914 }
 0x62a   : > { %v824_v49 = vsub.f32 %v814_v37, %v822_v47  ;;  %v917_v50 = vsub.f32 %v907_v63, %v915_v48 }
 0x62c   : > { %v1538_v51 = vpop.eup %1537  ;;  %v827_v52 = vmul.f32 1.442695, %v824_v49  ;;  %v920_v53 = vmul.f32 1.442695, %v917_v50 }
 0x62d   : > { %v829_v54 = vsel %vm428_vm0, %v1538_v51, 0.0 }
 0x62e   : > { %1539 = vpow2.f32 %v827_v52  ;;  %830 = vadd.xlane.f32.xlu2 %v829_v54 }
 0x62f   : > { %1541 = vpow2.f32 %v920_v53 }
 0x634   : > { %v1540_v55 = vpop.eup %1539 }
 0x635   : > { %v1542_v56 = vpop.eup %1541  ;;  %v832_v57 = vsel %vm428_vm0, %v1540_v55, 0.0 }
 0x636   : > { %833 = vadd.xlane.f32.xlu0 %v832_v57  ;;  %v925_v58 = vsel %vm428_vm0, %v1542_v56, 0.0 }
 0x637   : > { %926 = vadd.xlane.f32.xlu2 %v925_v58 }
 0x642   : > { %933 = vrot.lane.b32.xlu1 %v1874_v20, %s1635_s7  ;;  %s188_s7 = sand.u32 1, %s1621_s16  }
 0x643   : > { %s1255_s27 = sshll.u32 %s188_s7, 4  ;;  %s1174_s19 = scalar_lea.sflag [#allocation3], %s188_s7 }
 0x644   : > { %s190_s11 = scalar_lea.vmem [#allocation2], %s1255_s27 }
 0x645   : > { %s1186_s20 = sshll.u32 %s190_s11, 4  ;;  %s1187_s20 = int_to_ptr.vmem [resolvable:$true] %s1186_s20 }
 0x64a   : > { %840 = vrot.lane.b32.xlu0 %v1874_v20, %s1634_s6  ;;  %1072 = vrot.lane.b32.xlu1 %v1868_v18, %s1636_s13 }
 0x64f   : > { %1074 = vrot.lane.b32.xlu2 %v1862_v12, %s1636_s13 }
 0x652   : > { %981 = vrot.lane.b32.xlu0 %v1862_v12, %s1637_s14 }
 0x65a   : > { %979 = vrot.lane.b32.xlu0 %v1868_v18, %s1637_s14 }
 0x69c   : > { %v924_v61 = vpop.xlane.xlu1 %923 }
 0x69d   : > { %1543 = vrcp.f32 %v924_v61 }
 0x6a1   : > { %v831_v59 = vpop.xlane.xlu2 %830 }
 0x6a3   : > { %v1544_v1 = vpop.eup %1543 }
 0x6a4   : > { %v930_v12 = vmul.f32 %v1544_v1, %v1536_v45 }
 0x6a9   : > { %v834_v0 = vpop.xlane.xlu0 %833 }
 0x6aa   : > { %v927_v62 = vpop.xlane.xlu2 %926 }
 0x6ab   : > { %1545 = vrcp.f32 %v927_v62 }
 0x6ac   : > { %1547 = vrcp.f32 %v834_v0 }
 0x6ad   : > { %1549 = vrcp.f32 %v831_v59 }
 0x6b1   : > { %v1546_v2 = vpop.eup %1545 }
 0x6b2   : > { %v931_v4 = vmul.f32 %v1546_v2, %v1542_v56  ;;  %v1548_v6 = vpop.eup %1547  ;;  %v1075_v13 = vpop.permute.xlu2 %1074 }
 0x6b3   : > { %v1550_v7 = vpop.eup %1549  ;;  %v838_v8 = vmul.f32 %v1548_v6, %v1540_v55  ;;  %v1080_v15 = vsel %vm428_vm0, %v1075_v13, 0 }
 0x6b4   : > { %v934_v5 = vpop.permute.xlu1 %933  ;;  %v932_v18 = vpack.c.bf16 %v931_v4, %v930_v12  ;;  %v837_v10 = vmul.f32 %v1550_v7, %v1538_v51 }
 0x6b5   : > { %946 = vmatpush.bf16.msra.mxu1 %v934_v5 }
 0x6b6   : > { %v839_v14 = vpack.c.bf16 %v838_v8, %v837_v10 }
 0x6b8   : > { %1394 = vmatmul.msk.bf16.vlgmr.msra.gmra.mxu1 %vm428_vm0, %v932_v18 }
 0x6bc   : > { %v841_v11 = vpop.permute.xlu0 %840  ;;  %v1073_v26 = vpop.permute.xlu1 %1072 }
 0x6bd   : > { %853 = vmatpush.bf16.msrb.mxu2 %v841_v11 }
 0x6c0   : > { %1387 = vmatmul.msk.bf16.vlgmr.msrb.gmra.mxu2 %vm428_vm0, %v839_v14  ;;  %v1451_v14 = vld [vmem:[%s2060_s2 + $0x30] sm:$0xff] }
 0x6c1   : > { %970 = vmatpush.bf16.msra.mxu2 %v1450_v9  ;;  %1063 = vmatpush.bf16.msrb.mxu1 %v1451_v14 }
 0x6c4   : > { %v982_v16 = vpop.permute.xlu0 %981 }
 0x6c5   : > { %1089 = vmatpush.bf16.xpose.msrb.mxu2 %v1080_v15  ;;  %v987_v17 = vsel %vm428_vm0, %v982_v16, 0  ;;  %v1452_v15 = vld [vmem:[%s2060_s2 + $0x38] sm:$0xff] }
 0x6c6   : > { %996 = vmatpush.bf16.xpose.msra.mxu3 %v987_v17 }
 0x6cc   : > { %v980_v27 = vpop.permute.xlu0 %979 }
 0x735   : > { %v948_v19 = vpop.f32.mrf.mxu1 }
 0x73d   : > { %v950_v21 = vpop.f32.mrf.mxu1 }
 0x73e   : > { %v953_v22 = vpack.c.bf16 %v950_v21, %v948_v19 }
 0x740   : > { %1399 = vmatmul.msk.bf16.vlgmr.msra.gmra.mxu2 %vm428_vm0, %v953_v22 }
 0x743   : > { %v855_v23 = vpop.f32.mrf.mxu2 }
 0x74b   : > { %v857_v24 = vpop.f32.mrf.mxu2 }
 0x74c   : > { %v860_v25 = vpack.c.bf16 %v857_v24, %v855_v23 }
 0x74e   : > { %1392 = vmatmul.msk.bf16.vlgmr.msrb.gmra.mxu3 %vm428_vm0, %v860_v25 }
 0x750   : > { %1407 = vmatmul.msk.bf16.vlgmr.msrb.gmra.mxu2 %vm428_vm0, %v1073_v26  ;;  %v1502_v26 = vld [vmem:[%s2061_s3] ss:$0 sm:$0xff] }
 0x75e   : > { %1400 = vmatmul.msk.bf16.vlgmr.msra.gmra.mxu3 %vm428_vm0, %v980_v27 }
 0x7c3   : > { %v972_v29 = vpop.f32.mrf.mxu2 }
 0x7cb   : > { %v974_v30 = vpop.f32.mrf.mxu2 }
 0x7d1   : > { %v879_v31 = vpop.f32.mrf.mxu3 }
 0x7d2   : > { %v884_v32 = vadd.f32 %v879_v31, %v1954_v28 }
 0x7d3   : > { %v1091_v34 = vpop.f32.mrf.mxu2 }
 0x7d4   : > { %v1096_v35 = vsel %vm428_vm0, %v1091_v34, -inf  ;;  %v1995_v36 = vadd.f32 %v972_v29, %v884_v32 }
 0x7d5   : > { %1097 = vmax.xlane.f32.xlu2 %v1096_v35 }
 0x7d9   : > { %v881_v63 = vpop.f32.mrf.mxu3 }
 0x7da   : > { %v885_v37 = vadd.f32 %v881_v63, %v1957_v33 }
 0x7db   : > { %v1093_v38 = vpop.f32.mrf.mxu2 }
 0x7dc   : > { %v1099_v39 = vsel %vm428_vm0, %v1093_v38, -inf  ;;  %v1999_v3 = vadd.f32 %v974_v30, %v885_v37 }
 0x7dd   : > { %1100 = vmax.xlane.f32.xlu1 %v1099_v39 }
 0x7e1   : > { %v998_v40 = vpop.f32.mrf.mxu3 }
 0x7e2   : > { %v1003_v41 = vsel %vm428_vm0, %v998_v40, -inf }
 0x7e3   : > { %1004 = vmax.xlane.f32.xlu0 %v1003_v41 }
 0x7e9   : > { %v1000_v28 = vpop.f32.mrf.mxu3 }
 0x7ea   : > { %v1006_v42 = vsel %vm428_vm0, %v1000_v28, -inf }
 0x7eb   : > { %1007 = vmax.xlane.f32.xlu2 %v1006_v42 }
 0x848   : > { %v1098_v43 = vpop.xlane.xlu2 %1097 }
 0x849   : > { %v1102_v44 = vsub.f32 %v1091_v34, %v1098_v43 }
 0x84b   : > { %v1104_v45 = vmul.f32 1.442695, %v1102_v44 }
 0x84d   : > { %1551 = vpow2.f32 %v1104_v45 }
 0x850   : > { %v1101_v46 = vpop.xlane.xlu1 %1100 }
 0x851   : > { %v1103_v33 = vsub.f32 %v1093_v38, %v1101_v46 }
 0x853   : > { %v1552_v47 = vpop.eup %1551  ;;  %v1106_v48 = vmul.f32 1.442695, %v1103_v33 }
 0x854   : > { %v1108_v49 = vsel %vm428_vm0, %v1552_v47, 0.0 }
 0x855   : > { %1553 = vpow2.f32 %v1106_v48  ;;  %1109 = vadd.xlane.f32.xlu1 %v1108_v49 }
 0x856   : > { %v1005_v50 = vpop.xlane.xlu0 %1004 }
 0x857   : > { %v1009_v51 = vsub.f32 %v998_v40, %v1005_v50 }
 0x859   : > { %v1011_v52 = vmul.f32 1.442695, %v1009_v51 }
 0x85b   : > { %v1554_v53 = vpop.eup %1553  ;;  %1555 = vpow2.f32 %v1011_v52 }
 0x85c   : > { %v1111_v54 = vsel %vm428_vm0, %v1554_v53, 0.0 }
 0x85d   : > { %1112 = vadd.xlane.f32.xlu0 %v1111_v54 }
 0x85e   : > { %v1008_v55 = vpop.xlane.xlu2 %1007 }
 0x85f   : > { %v1010_v56 = vsub.f32 %v1000_v28, %v1008_v55 }
 0x861   : > { %v1556_v57 = vpop.eup %1555  ;;  %v1013_v58 = vmul.f32 1.442695, %v1010_v56 }
 0x862   : > { %v1015_v59 = vsel %vm428_vm0, %v1556_v57, 0.0 }
 0x863   : > { %1557 = vpow2.f32 %v1013_v58  ;;  %1016 = vadd.xlane.f32.xlu2 %v1015_v59 }
 0x869   : > { %v1558_v60 = vpop.eup %1557 }
 0x86a   : > { %v1018_v61 = vsel %vm428_vm0, %v1558_v60, 0.0 }
 0x86b   : > { %1019 = vadd.xlane.f32.xlu1 %v1018_v61 }
 0x871   : > { %1119 = vrot.lane.b32.xlu0 %v1874_v20, %s1636_s13 }
 0x87b   : > { %1026 = vrot.lane.b32.xlu2 %v1874_v20, %s1637_s14  ;;  %s1185_s14 = scalar_lea.hbm %s2062_s4, %s1453_s10 }
 0x87c   : > { %s1188_s22 = sshll.u32 %s1185_s14, 4  ;;  %s1189_s22 = int_to_ptr.hbm [resolvable:$true] %s1188_s22 }
 0x87d   : > { %s1581_s23 = sshra.s32 %s1189_s22, 4  ;;  %s1582_s23 = int_to_ptr.hbm [resolvable:$true] %s1581_s23 }
 0x87e   : > { %s1583_s28 = scalar_lea.hbm %s1582_s23, 16  ;;  %p1588_p0 = scmp.lt.s32.totalorder %s1582_s23, %s2062_s4 }
 0x87f   : > { %p1584_p11 = scmp.ne.s32.totalorder %s1582_s23, %s1583_s28  ;;  %p1589_p1 = scmp.lt.s32.totalorder %s1587_s5, %s1583_s28 }
 0x881   : > { %p1585_p12 = pnand %p1584_p11, %p1703_p5  ;;  %p1590_p2 = por %p1589_p1, %p1588_p0 }
 0x883   : > { %p1586_p13 = pneg %p1585_p12 }
 0x885   : > { %p1591_p3 = pnand %p1590_p2, %p1586_p13 }
 0x8c8   : > { %v1110_v0 = vpop.xlane.xlu1 %1109 }
 0x8d0   : > { %v1113_v62 = vpop.xlane.xlu0 %1112 }
 0x8d1   : > { %1559 = vrcp.f32 %v1113_v62 }
 0x8d2   : > { %1561 = vrcp.f32 %v1110_v0 }
 0x8d6   : > { %v1017_v1 = vpop.xlane.xlu2 %1016 }
 0x8d7   : > { %1563 = vrcp.f32 %v1017_v1  ;;  %v1560_v2 = vpop.eup %1559 }
 0x8d8   : > { %v1562_v5 = vpop.eup %1561  ;;  %v1117_v18 = vmul.f32 %v1560_v2, %v1554_v53 }
 0x8d9   : > { %v1116_v7 = vmul.f32 %v1562_v5, %v1552_v47 }
 0x8db   : > { %v1118_v10 = vpack.c.bf16 %v1117_v18, %v1116_v7 }
 0x8dd   : > { %v1564_v6 = vpop.eup %1563 }
 0x8de   : > { %v1027_v4 = vpop.permute.xlu2 %1026  ;;  %v1020_v12 = vpop.xlane.xlu1 %1019  ;;  %v1023_v20 = vmul.f32 %v1564_v6, %v1556_v57 }
 0x8df   : > { %1565 = vrcp.f32 %v1020_v12  ;;  %1039 = vmatpush.bf16.msrb.mxu0 %v1027_v4 }
 0x8e3   : > { %v1120_v8 = vpop.permute.xlu0 %1119  ;;  %1156 = vmatpush.bf16.msra.mxu0 %v1452_v15 }
 0x8e4   : > { %1132 = vmatpush.bf16.msrb.mxu3 %v1120_v8 }
 0x8e5   : > { %v1566_v9 = vpop.eup %1565 }
 0x8e6   : > { %v1024_v11 = vmul.f32 %v1566_v9, %v1558_v60 }
 0x8e7   : > { %1408 = vmatmul.msk.bf16.vlgmr.msrb.gmra.mxu3 %vm428_vm0, %v1118_v10 }
 0x8e8   : > { %v1025_v13 = vpack.c.bf16 %v1024_v11, %v1023_v20 }
 0x8ea   : > { %1401 = vmatmul.msk.bf16.vlgmr.msrb.gmra.mxu0 %vm428_vm0, %v1025_v13 }
 0x967   : > { %v1041_v16 = vpop.f32.mrf.mxu0 }
 0x96a   : > { %v1134_v17 = vpop.f32.mrf.mxu3 }
 0x96f   : > { %v1043_v19 = vpop.f32.mrf.mxu0 }
 0x970   : > { %v1046_v21 = vpack.c.bf16 %v1043_v19, %v1041_v16 }
 0x972   : > { %1406 = vmatmul.msk.bf16.vlgmr.msrb.gmra.mxu1 %vm428_vm0, %v1046_v21  ;;  %v1136_v22 = vpop.f32.mrf.mxu3 }
 0x973   : > { %v1139_v23 = vpack.c.bf16 %v1136_v22, %v1134_v17 }
 0x975   : > { %1413 = vmatmul.msk.bf16.vlgmr.msra.gmra.mxu0 %vm428_vm0, %v1139_v23 }
 0x9ef   : > { %v1065_v24 = vpop.f32.mrf.mxu1 }
 0x9f0   : > { %v1070_v25 = vadd.f32 %v1065_v24, %v1995_v36 }
 0x9f2   : > { %v1158_v27 = vpop.f32.mrf.mxu0 }
 0x9f3   : > { %v1163_v29 = vadd.f32 %v1158_v27, %v1070_v25 }
 0x9f5   : > { %v1169_v30 = vadd.f32 %v1502_v26, %v1163_v29 }
 0x9f7   : > { %1171 = vst [vmem:[%s190_s11] sm:$0xff] %v1169_v30  ;;  %v1067_v31 = vpop.f32.mrf.mxu1 }
 0x9f8   : > { %v1071_v32 = vadd.f32 %v1067_v31, %v1999_v3 }
 0x9fa   : > { %v1160_v34 = vpop.f32.mrf.mxu0 }
 0x9fb   : > { %v1164_v35 = vadd.f32 %v1160_v34, %v1071_v32 }
 0x9fd   : > { %v1170_v36 = vadd.f32 %v1502_v26, %v1164_v35 }
 0x9ff   : > { %1172 = vst [vmem:[%s190_s11 + $0x8] sm:$0xff] %v1170_v36 }
 0xa00   : > { %1594 = shalt.err (!%p1591_p3)
}
 0xa01   : > { %s1638_s7 = smov 128   ;;  %s1639_s8 = smov 8  }
 0xa02   : > { %1454 = dma.vmem_to_hbm [thread:$0]  (%p1703_p5), %s1187_s20, 256, %s1189_s22, %s1174_s19, %s1638_s7, %s1638_s7, %s1639_s8  }
 0xa03 PF: > { %p1460_p4 = scmp.ge.s32.totalorder %s1629_s18, 2  ;;  %s1203_s9 = sand.u32 1, %s1617_s15  }
 0xa04   : > { %s1204_s10 = scalar_lea.sflag [#allocation3], %s1203_s9 }
 0xa05   : > { %p1457_p7 = pnand %p1460_p4, %p1707_p6 }
 0xa07   : > { %p1458_p8 = pneg %p1457_p7 }
 0xa09   : > { %1612 = dma.done.wait (%p1458_p8), %s1204_s10, 256  }
 0xa0a   : > { %1614 = vsyncadd (%p1458_p8), %s1204_s10, 4294967040  ;;  %p14_p9 = scmp.ge.s32.totalorder %s1690_s21, 4   ;;  %s2065_s15 = smov %s1621_s16 }
 0xa0b   : > { %s2066_s16 = smov %s1625_s17  ;;  %s2067_s17 = smov %s1701_s24 }
 0xa0c   : > { %s2068_s18 = smov %s1690_s21  ;;  %16 = sbr.rel (!%p14_p9) target bundleno = 3 (0x3), region = 71 }
 0xa11   :  { %1210 = vsyncpa [#allocation3], 1 }
 0xa12   :  { %1212 = vsyncpa [#allocation3 + $0x1], 1 }

</bundles_post_ra>
